<compile_context>
chip_gen: v7x
topology: tpu7x:2x2x1
jax: 0.10.0
libtpu: 0.0.40
codegen_flags: <defaults>
</compile_context>

<pallas_src>
import math
import jax
import jax.numpy as jnp
from jax.experimental import pallas as pl
from jax.experimental.pallas import tpu as pltpu

D_MODEL = 512
N_HEADS = 4
HEAD_DIM = D_MODEL // N_HEADS   # 128
D_FF = 2048
N_LAYERS = 8
CHUNK = 6
LN_EPS = 1e-5
VMEM_LIMIT = 48 * 1024 * 1024
NBT = 1                         # batch tiles (grid axis marked "parallel")

SQRT_D = math.sqrt(float(D_MODEL))          # Python float (literal)
ATTN_SCALE = 1.0 / math.sqrt(float(HEAD_DIM))  # Python float (literal)


# ----------------------------------------------------------------------------
# in-kernel helpers (traced inside pallas kernels)
# ----------------------------------------------------------------------------
def _layer_norm(x, g, b):
    # x: (R, D) f32, g/b: (1, D).  PyTorch LayerNorm: biased variance, eps=1e-5.
    mu = jnp.mean(x, axis=-1, keepdims=True)
    var = jnp.mean((x - mu) ** 2, axis=-1, keepdims=True)
    return (x - mu) * jax.lax.rsqrt(var + LN_EPS) * g + b


def _softmax_last(x):
    m = jnp.max(x, axis=-1, keepdims=True)
    e = jnp.exp(x - m)
    s = jnp.sum(e, axis=-1, keepdims=True)
    return e * pl.reciprocal(s, approx=True)      # EUP reciprocal (free slot)


def _sigmoid(x):
    # overflow-safe sigmoid (no exp of large positive values)
    z = jnp.exp(-jnp.abs(x))
    r = pl.reciprocal(1.0 + z, approx=True)
    return jnp.where(x >= 0, r, z * r)


# ----------------------------------------------------------------------------
# kernel 1: embed = Linear(in,512) -> LayerNorm -> (Dropout) -> ReLU -> PosEnc
#   operates on the (B*S, in_dim) folded slab.
# ----------------------------------------------------------------------------
def embed_kernel(x_ref, w_ref, b_ref, g_ref, beta_ref, pe_ref, o_ref):
    x = x_ref[...]                                                 # (R, Fin) f32
    h = jnp.dot(x.astype(jnp.bfloat16), w_ref[...],
                preferred_element_type=jnp.float32) + b_ref[...]
    h = _layer_norm(h, g_ref[...], beta_ref[...])
    h = jnp.maximum(h, 0.0)
    # TODO(synk): PositionalEncoding implementation not shown in reference;
    # assumed ESPnet-style: x * sqrt(d_model) + sinusoidal_pe, dropout=identity.
    o_ref[...] = h * SQRT_D + pe_ref[...]


def embed_forward(x2d, pe, params):
    ROWS, Fin = x2d.shape
    rows_t = ROWS // NBT
    return pl.pallas_call(
        embed_kernel,
        out_shape=jax.ShapeDtypeStruct((ROWS, D_MODEL), jnp.float32),
        grid=(NBT,),
        in_specs=[
            pl.BlockSpec((rows_t, Fin), lambda i: (i, 0)),
            pl.BlockSpec((Fin, D_MODEL), lambda i: (0, 0)),
            pl.BlockSpec((1, D_MODEL), lambda i: (0, 0)),
            pl.BlockSpec((1, D_MODEL), lambda i: (0, 0)),
            pl.BlockSpec((1, D_MODEL), lambda i: (0, 0)),
            pl.BlockSpec((rows_t, D_MODEL), lambda i: (i, 0)),
        ],
        out_specs=pl.BlockSpec((rows_t, D_MODEL), lambda i: (i, 0)),
        compiler_params=pltpu.CompilerParams(
            dimension_semantics=("parallel",),
            vmem_limit_bytes=VMEM_LIMIT),
    )(x2d, params["emb_w"], params["emb_b"], params["emb_g"],
      params["emb_beta"], pe)


# ----------------------------------------------------------------------------
# kernel 2: ALL 8 EncoderLayers fused.  grid = (batch_tiles, N_LAYERS).
#   x = x + MHA(LN1(x), mask) ; x = x + FFN(LN2(x))     (pre-norm residuals)
#   The activation lives in o_ref (resident across the layer axis).
# ----------------------------------------------------------------------------
def encoder_stack_kernel(x_ref, bias_ref,
                         ln1g_ref, ln1b_ref, wqkv_ref, bqkv_ref,
                         wo_ref, bo_ref, ln2g_ref, ln2b_ref,
                         w1_ref, b1_ref, w2_ref, b2_ref,
                         o_ref):
    l = pl.program_id(1)

    @pl.when(l == 0)
    def _():
        o_ref[...] = x_ref[...]

    x = o_ref[...]                                     # (R, 512) f32, resident
    bias = bias_ref[...]                               # (R, R) f32 block-diag

    # ---- self-attention block ----
    xn = _layer_norm(x, ln1g_ref[0], ln1b_ref[0])
    qkv = jnp.dot(xn.astype(jnp.bfloat16), wqkv_ref[0],
                  preferred_element_type=jnp.float32) + bqkv_ref[0]
    qkv_bf = qkv.astype(jnp.bfloat16)
    wo = wo_ref[0]                                     # (512, 512) bf16

    attn_out = jnp.zeros(x.shape, jnp.float32)
    for h in range(N_HEADS):                           # static 4-head loop
        c0 = h * HEAD_DIM
        qh = qkv_bf[:, c0:c0 + HEAD_DIM]
        kh = qkv_bf[:, D_MODEL + c0:D_MODEL + c0 + HEAD_DIM]
        vh = qkv_bf[:, 2 * D_MODEL + c0:2 * D_MODEL + c0 + HEAD_DIM]
        scores = jax.lax.dot_general(qh, kh, (((1,), (1,)), ((), ())),
                                     preferred_element_type=jnp.float32)
        scores = scores * ATTN_SCALE + bias            # mask add kept in f32
        attn = _softmax_last(scores)
        ctx = jnp.dot(attn.astype(jnp.bfloat16), vh,
                      preferred_element_type=jnp.float32)
        # accumulate through W_o slice -> no lane concat of heads
        attn_out = attn_out + jnp.dot(ctx.astype(jnp.bfloat16),
                                      wo[c0:c0 + HEAD_DIM, :],
                                      preferred_element_type=jnp.float32)
    x = x + attn_out + bo_ref[0]                       # dropout1 = identity

    # ---- feed-forward block ----
    xn2 = _layer_norm(x, ln2g_ref[0], ln2b_ref[0])
    h1 = jnp.dot(xn2.astype(jnp.bfloat16), w1_ref[0],
                 preferred_element_type=jnp.float32) + b1_ref[0]
    h1 = jnp.maximum(h1, 0.0)
    ff = jnp.dot(h1.astype(jnp.bfloat16), w2_ref[0],
                 preferred_element_type=jnp.float32) + b2_ref[0]
    o_ref[...] = x + ff                                # dropout2 = identity


def encoder_stack_forward(x2d, mask_bias, params):
    ROWS = x2d.shape[0]
    rows_t = ROWS // NBT

    def per_layer(shape):
        nzero = len(shape)
        return pl.BlockSpec((1,) + shape, lambda bt, l: (l,) + (0,) * nzero)

    return pl.pallas_call(
        encoder_stack_kernel,
        out_shape=jax.ShapeDtypeStruct((ROWS, D_MODEL), jnp.float32),
        grid=(NBT, N_LAYERS),
        in_specs=[
            pl.BlockSpec((rows_t, D_MODEL), lambda bt, l: (bt, 0)),
            pl.BlockSpec((rows_t, rows_t), lambda bt, l: (bt, bt)),
            per_layer((1, D_MODEL)), per_layer((1, D_MODEL)),          # ln1 g,b
            per_layer((D_MODEL, 3 * D_MODEL)),                         # wqkv
            per_layer((1, 3 * D_MODEL)),                               # bqkv
            per_layer((D_MODEL, D_MODEL)), per_layer((1, D_MODEL)),    # wo, bo
            per_layer((1, D_MODEL)), per_layer((1, D_MODEL)),          # ln2 g,b
            per_layer((D_MODEL, D_FF)), per_layer((1, D_FF)),          # w1, b1
            per_layer((D_FF, D_MODEL)), per_layer((1, D_MODEL)),       # w2, b2
        ],
        out_specs=pl.BlockSpec((rows_t, D_MODEL), lambda bt, l: (bt, 0)),
        compiler_params=pltpu.CompilerParams(
            dimension_semantics=("parallel", "arbitrary"),
            vmem_limit_bytes=VMEM_LIMIT),
    )(x2d, mask_bias,
      params["ln1_g"], params["ln1_b"],
      params["wqkv"], params["bqkv"], params["wo"], params["bo"],
      params["ln2_g"], params["ln2_b"],
      params["w1"], params["b1"], params["w2"], params["b2"])


# ----------------------------------------------------------------------------
# kernel 3: head = Linear(512, out) -> LayerNorm(out) -> Sigmoid
#   fc weight is padded to 128 output lanes (lane-dense stores); the LayerNorm
#   statistics are masked to the real out_dim.  Wrapper slices back.
#   NOTE: only Python scalars are captured by the closure (literal-safe); the
#   lane mask is built in-kernel from a (staged) iota.
# ----------------------------------------------------------------------------
def make_head_kernel(out_dim, out_pad):
    inv_n = 1.0 / float(out_dim)          # Python float -> jaxpr literal

    def head_kernel(x_ref, wf_ref, bf_ref, g_ref, b_ref, o_ref):
        x = x_ref[...]                                             # (R, 512) f32
        y = jnp.dot(x.astype(jnp.bfloat16), wf_ref[...],
                    preferred_element_type=jnp.float32) + bf_ref[...]
        col = jax.lax.broadcasted_iota(jnp.int32, (1, out_pad), 1)
        m = (col < out_dim).astype(jnp.float32)
        mu = jnp.sum(y * m, axis=-1, keepdims=True) * inv_n
        var = jnp.sum(((y - mu) ** 2) * m, axis=-1, keepdims=True) * inv_n
        yn = (y - mu) * jax.lax.rsqrt(var + LN_EPS) * g_ref[...] + b_ref[...]
        o_ref[...] = _sigmoid(yn)

    return head_kernel


def head_forward(x2d, params, out_dim):
    ROWS = x2d.shape[0]
    out_pad = int(params["fc_w"].shape[1])
    rows_t = ROWS // NBT
    return pl.pallas_call(
        make_head_kernel(out_dim, out_pad),
        out_shape=jax.ShapeDtypeStruct((ROWS, out_pad), jnp.float32),
        grid=(NBT,),
        in_specs=[
            pl.BlockSpec((rows_t, D_MODEL), lambda i: (i, 0)),
            pl.BlockSpec((D_MODEL, out_pad), lambda i: (0, 0)),
            pl.BlockSpec((1, out_pad), lambda i: (0, 0)),
            pl.BlockSpec((1, out_pad), lambda i: (0, 0)),
            pl.BlockSpec((1, out_pad), lambda i: (0, 0)),
        ],
        out_specs=pl.BlockSpec((rows_t, out_pad), lambda i: (i, 0)),
        compiler_params=pltpu.CompilerParams(
            dimension_semantics=("parallel",),
            vmem_limit_bytes=VMEM_LIMIT),
    )(x2d, params["fc_w"], params["fc_b"], params["after_g"], params["after_b"])


# ----------------------------------------------------------------------------
# glue (plain JAX): positional encoding, chunk mask, parameters, full forward
# ----------------------------------------------------------------------------
def make_positional_encoding(seq_len):
    pos = jnp.arange(seq_len, dtype=jnp.float32)[:, None]
    div = jnp.exp(jnp.arange(0, D_MODEL, 2, dtype=jnp.float32)
                  * (-math.log(10000.0) / D_MODEL))
    pe_sin = jnp.sin(pos * div)
    pe_cos = jnp.cos(pos * div)
    return jnp.stack([pe_sin, pe_cos], axis=-1).reshape(seq_len, D_MODEL)


def make_block_chunk_mask_bias(batch, seq_len, chunk):
    # TODO(synk): chunk_mask implementation not shown in reference; assumed
    # streaming chunk mask: position i attends to j < ((i//chunk)+1)*chunk.
    rows = jnp.arange(seq_len)[:, None]
    cols = jnp.arange(seq_len)[None, :]
    allowed = cols < ((rows // chunk) + 1) * chunk
    blk = jnp.where(allowed, 0.0, -1e9).astype(jnp.float32)        # (S, S)
    eye = jnp.eye(batch, dtype=jnp.float32)
    # batch-block-diagonal mask so attention over the folded (B*S) rows never
    # crosses sequence boundaries.
    big = jnp.kron(eye, blk) + jnp.kron(1.0 - eye,
                                        jnp.full((seq_len, seq_len), -1e9,
                                                 jnp.float32))
    return big                                                     # (B*S, B*S)


def init_params(key, in_dim, out_dim, out_pad):
    def w_init(k, shape, scale=0.02):
        return jax.random.normal(k, shape, jnp.float32) * scale

    keys = jax.random.split(key, 6)
    p = {}
    p["emb_w"] = w_init(keys[0], (in_dim, D_MODEL)).astype(jnp.bfloat16)
    p["emb_b"] = jnp.zeros((1, D_MODEL), jnp.float32)
    p["emb_g"] = jnp.ones((1, D_MODEL), jnp.float32)
    p["emb_beta"] = jnp.zeros((1, D_MODEL), jnp.float32)

    p["ln1_g"] = jnp.ones((N_LAYERS, 1, D_MODEL), jnp.float32)
    p["ln1_b"] = jnp.zeros((N_LAYERS, 1, D_MODEL), jnp.float32)
    p["wqkv"] = w_init(keys[1], (N_LAYERS, D_MODEL, 3 * D_MODEL)).astype(jnp.bfloat16)
    p["bqkv"] = jnp.zeros((N_LAYERS, 1, 3 * D_MODEL), jnp.float32)
    p["wo"] = w_init(keys[2], (N_LAYERS, D_MODEL, D_MODEL)).astype(jnp.bfloat16)
    p["bo"] = jnp.zeros((N_LAYERS, 1, D_MODEL), jnp.float32)
    p["ln2_g"] = jnp.ones((N_LAYERS, 1, D_MODEL), jnp.float32)
    p["ln2_b"] = jnp.zeros((N_LAYERS, 1, D_MODEL), jnp.float32)
    p["w1"] = w_init(keys[3], (N_LAYERS, D_MODEL, D_FF)).astype(jnp.bfloat16)
    p["b1"] = jnp.zeros((N_LAYERS, 1, D_FF), jnp.float32)
    p["w2"] = w_init(keys[4], (N_LAYERS, D_FF, D_MODEL)).astype(jnp.bfloat16)
    p["b2"] = jnp.zeros((N_LAYERS, 1, D_MODEL), jnp.float32)

    fc_w = w_init(keys[5], (D_MODEL, out_dim))
    p["fc_w"] = jnp.pad(fc_w, ((0, 0), (0, out_pad - out_dim))).astype(jnp.bfloat16)
    p["fc_b"] = jnp.zeros((1, out_pad), jnp.float32)
    p["after_g"] = jnp.pad(jnp.ones((1, out_dim), jnp.float32),
                           ((0, 0), (0, out_pad - out_dim)))
    p["after_b"] = jnp.zeros((1, out_pad), jnp.float32)
    return p


def encoder_forward(params, input_features, out_dim):
    B, S, Fin = input_features.shape
    x2d = input_features.reshape(B * S, Fin)                 # fold batch into M
    pe = jnp.tile(make_positional_encoding(S), (B, 1))       # (B*S, 512)
    mask_bias = make_block_chunk_mask_bias(B, S, CHUNK)      # (B*S, B*S)

    h = embed_forward(x2d, pe, params)
    h = encoder_stack_forward(h, mask_bias, params)
    y = head_forward(h, params, out_dim)                     # (B*S, out_pad)
    return y.reshape(B, S, -1)[:, :, :out_dim]


if __name__ == "__main__":
    key = jax.random.PRNGKey(0)
    B, S = 2, 12                      # seq = 2 chunks of 6
    IN_DIM, OUT_DIM = 24, 32          # input_feature_size, decoder_feature_size
    OUT_PAD = 128                     # lane-dense head output, sliced in wrapper

    k_param, k_x = jax.random.split(key)
    params = init_params(k_param, IN_DIM, OUT_DIM, OUT_PAD)
    x = jax.random.normal(k_x, (B, S, IN_DIM), jnp.float32)

    out = encoder_forward(params, x, OUT_DIM)
    out = jax.block_until_ready(out)
    assert out.shape == (B, S, OUT_DIM)
    assert bool(jnp.all(jnp.isfinite(out)))
    assert bool(jnp.all((out >= 0.0) & (out <= 1.0)))   # sigmoid range
    print("KERNEL_OK")
</pallas_src>

<mosaic_0001>
module attributes {stable_mosaic.version = 11 : i64} {
  func.func @embed_kernel(%arg0: i32, %arg1: memref<24x24xf32, #tpu.memory_space<vmem>>, %arg2: memref<24x512xbf16, #tpu.memory_space<vmem>>, %arg3: memref<1x512xf32, #tpu.memory_space<vmem>>, %arg4: memref<1x512xf32, #tpu.memory_space<vmem>>, %arg5: memref<1x512xf32, #tpu.memory_space<vmem>>, %arg6: memref<24x512xf32, #tpu.memory_space<vmem>>, %arg7: memref<24x512xf32, #tpu.memory_space<vmem>>) attributes {dimension_semantics = [#tpu.dimension_semantics<parallel>], iteration_bounds = array<i64: 1>, scalar_prefetch = 0 : i64, scratch_operands = 0 : i64, tpu.core_type = #tpu.core_type<tc>, window_params = [{transform_indices = @transform_0, window_bounds = array<i64: 24, 24>}, {pipeline_mode = #tpu.pipeline_mode<synchronous>, transform_indices = @transform_1, window_bounds = array<i64: 24, 512>}, {pipeline_mode = #tpu.pipeline_mode<synchronous>, transform_indices = @transform_2, window_bounds = array<i64: 1, 512>}, {pipeline_mode = #tpu.pipeline_mode<synchronous>, transform_indices = @transform_3, window_bounds = array<i64: 1, 512>}, {pipeline_mode = #tpu.pipeline_mode<synchronous>, transform_indices = @transform_4, window_bounds = array<i64: 1, 512>}, {transform_indices = @transform_5, window_bounds = array<i64: 24, 512>}, {transform_indices = @transform_6, window_bounds = array<i64: 24, 512>}]} {
    %c0 = arith.constant 0 : index
    %c0_0 = arith.constant 0 : index
    %0 = vector.load %arg1[%c0, %c0_0] : memref<24x24xf32, #tpu.memory_space<vmem>>, vector<24x24xf32>
    %1 = arith.truncf %0 : vector<24x24xf32> to vector<24x24xbf16>
    %c0_1 = arith.constant 0 : index
    %c0_2 = arith.constant 0 : index
    %2 = vector.load %arg2[%c0_1, %c0_2] : memref<24x512xbf16, #tpu.memory_space<vmem>>, vector<24x512xbf16>
    %cst = arith.constant dense<0.000000e+00> : vector<24x512xf32>
    %3 = tpu.matmul %1, %2, %cst {dimension_numbers = #tpu.dot_dimension_numbers<[1], [0], [0], [1], [0, 0, 1, 1], [], []>} : vector<24x24xbf16>, vector<24x512xbf16>, vector<24x512xf32> -> vector<24x512xf32>
    %c0_3 = arith.constant 0 : index
    %c0_4 = arith.constant 0 : index
    %4 = vector.load %arg3[%c0_3, %c0_4] : memref<1x512xf32, #tpu.memory_space<vmem>>, vector<1x512xf32>
    %5 = vector.broadcast %4 : vector<1x512xf32> to vector<24x512xf32>
    %6 = arith.addf %3, %5 : vector<24x512xf32>
    %c0_5 = arith.constant 0 : index
    %c0_6 = arith.constant 0 : index
    %7 = vector.load %arg4[%c0_5, %c0_6] : memref<1x512xf32, #tpu.memory_space<vmem>>, vector<1x512xf32>
    %c0_7 = arith.constant 0 : index
    %c0_8 = arith.constant 0 : index
    %8 = vector.load %arg5[%c0_7, %c0_8] : memref<1x512xf32, #tpu.memory_space<vmem>>, vector<1x512xf32>
    %cst_9 = arith.constant dense<0.000000e+00> : vector<24xf32>
    %9 = vector.multi_reduction <add>, %6, %cst_9 [1] : vector<24x512xf32> to vector<24xf32>
    %10 = vector.shape_cast %9 : vector<24xf32> to vector<24x1xf32>
    %cst_10 = arith.constant 5.120000e+02 : f32
    %11 = vector.broadcast %cst_10 : f32 to vector<24x1xf32>
    %12 = arith.divf %10, %11 : vector<24x1xf32>
    %13 = vector.broadcast %12 : vector<24x1xf32> to vector<24x512xf32>
    %14 = arith.subf %6, %13 : vector<24x512xf32>
    %15 = arith.mulf %14, %14 : vector<24x512xf32>
    %cst_11 = arith.constant dense<0.000000e+00> : vector<24xf32>
    %16 = vector.multi_reduction <add>, %15, %cst_11 [1] : vector<24x512xf32> to vector<24xf32>
    %17 = vector.shape_cast %16 : vector<24xf32> to vector<24x1xf32>
    %cst_12 = arith.constant 5.120000e+02 : f32
    %18 = vector.broadcast %cst_12 : f32 to vector<24x1xf32>
    %19 = arith.divf %17, %18 : vector<24x1xf32>
    %20 = vector.broadcast %12 : vector<24x1xf32> to vector<24x512xf32>
    %21 = arith.subf %6, %20 : vector<24x512xf32>
    %cst_13 = arith.constant 9.99999974E-6 : f32
    %22 = vector.broadcast %cst_13 : f32 to vector<24x1xf32>
    %23 = arith.addf %19, %22 : vector<24x1xf32>
    %24 = math.rsqrt %23 : vector<24x1xf32>
    %25 = vector.broadcast %24 : vector<24x1xf32> to vector<24x512xf32>
    %26 = arith.mulf %21, %25 : vector<24x512xf32>
    %27 = vector.broadcast %7 : vector<1x512xf32> to vector<24x512xf32>
    %28 = arith.mulf %26, %27 : vector<24x512xf32>
    %29 = vector.broadcast %8 : vector<1x512xf32> to vector<24x512xf32>
    %30 = arith.addf %28, %29 : vector<24x512xf32>
    %cst_14 = arith.constant 0.000000e+00 : f32
    %31 = vector.broadcast %cst_14 : f32 to vector<24x512xf32>
    %32 = arith.maximumf %30, %31 : vector<24x512xf32>
    %cst_15 = arith.constant 22.6274166 : f32
    %33 = vector.broadcast %cst_15 : f32 to vector<24x512xf32>
    %34 = arith.mulf %32, %33 : vector<24x512xf32>
    %c0_16 = arith.constant 0 : index
    %c0_17 = arith.constant 0 : index
    %35 = vector.load %arg6[%c0_16, %c0_17] : memref<24x512xf32, #tpu.memory_space<vmem>>, vector<24x512xf32>
    %36 = arith.addf %34, %35 : vector<24x512xf32>
    %c0_18 = arith.constant 0 : index
    %c0_19 = arith.constant 0 : index
    %37 = vector.load %arg7[%c0_18, %c0_19] : memref<24x512xf32, #tpu.memory_space<vmem>>, vector<24x512xf32>
    tpu.vector_store %arg7[%c0_18, %c0_19], %36 {strides = array<i32>} : memref<24x512xf32, #tpu.memory_space<vmem>>, vector<24x512xf32>,
    return
  }
  func.func @transform_0(%arg0: i32) -> (i32, i32) {
    %c0_i32 = arith.constant 0 : i32
    %c0_i32_0 = arith.constant 0 : i32
    return %arg0, %c0_i32 : i32, i32
  }
  func.func @transform_1(%arg0: i32) -> (i32, i32) {
    %c0_i32 = arith.constant 0 : i32
    %c0_i32_0 = arith.constant 0 : i32
    %c0_i32_1 = arith.constant 0 : i32
    return %c0_i32, %c0_i32_0 : i32, i32
  }
  func.func @transform_2(%arg0: i32) -> (i32, i32) {
    %c0_i32 = arith.constant 0 : i32
    %c0_i32_0 = arith.constant 0 : i32
    %c0_i32_1 = arith.constant 0 : i32
    return %c0_i32, %c0_i32_0 : i32, i32
  }
  func.func @transform_3(%arg0: i32) -> (i32, i32) {
    %c0_i32 = arith.constant 0 : i32
    %c0_i32_0 = arith.constant 0 : i32
    %c0_i32_1 = arith.constant 0 : i32
    return %c0_i32, %c0_i32_0 : i32, i32
  }
  func.func @transform_4(%arg0: i32) -> (i32, i32) {
    %c0_i32 = arith.constant 0 : i32
    %c0_i32_0 = arith.constant 0 : i32
    %c0_i32_1 = arith.constant 0 : i32
    return %c0_i32, %c0_i32_0 : i32, i32
  }
  func.func @transform_5(%arg0: i32) -> (i32, i32) {
    %c0_i32 = arith.constant 0 : i32
    %c0_i32_0 = arith.constant 0 : i32
    return %arg0, %c0_i32 : i32, i32
  }
  func.func @transform_6(%arg0: i32) -> (i32, i32) {
    %c0_i32 = arith.constant 0 : i32
    %c0_i32_0 = arith.constant 0 : i32
    return %arg0, %c0_i32 : i32, i32
  }
}

</mosaic_0001>

<bundles_post_ra>
// kernel: tpu_custom_call.1
= control target key start
LH: loop header
LB: loop body
LE: loop exit
PB: predicated region body
PF: predicated region fallthrough
CT: control target
= control target key end

     0   :  { %11 = vsyncpa [#allocation3], 0  ;;  %s795_s0 = inlined_call_operand.hbm [shape: f32[24,24], index: 0, kind: input, shape index: {}]   ;;  %s796_s1 = inlined_call_operand.hbm [shape: bf16[24,512], index: 1, kind: input, shape index: {}]   ;;  %s797_s2 = inlined_call_operand.vmem [shape: f32[1,512], index: 2, kind: input, shape index: {}]   ;;  %s798_s3 = inlined_call_operand.vmem [shape: f32[1,512], index: 3, kind: input, shape index: {}]   ;;  %s799_s4 = inlined_call_operand.vmem [shape: f32[1,512], index: 4, kind: input, shape index: {}]   ;;  %s800_s5 = inlined_call_operand.hbm [shape: f32[24,512], index: 5, kind: input, shape index: {}]   ;;  %s801_s6 = inlined_call_operand.hbm [shape: f32[24,512], index: 6, kind: output, shape index: {}]  }
   0x1   :  { %12 = vsyncpa [#allocation6], 0 }
   0x2   :  { %13 = vsyncpa [#allocation4], 0  ;;  %s611_s21 = smov [#allocation5]   ;;  %s517_s25 = scalar_lea.hbm %s796_s1, 768 }
   0x3   :  { %s31_s22 = sshll.u32 %s611_s21, 4  ;;  %p518_p0 = scmp.ne.s32.totalorder %s796_s1, %s517_s25  ;;  %s32_s22 = int_to_ptr.vmem [resolvable:$true] %s31_s22 }
   0x4   :  { %p521_p1 = scmp.lt.u32.totalorder %s517_s25, %s796_s1 }
   0x6   :  { %p523_p2 = pnand %p521_p1, %p518_p0 }
   0x8   :  { %526 = shalt.err (!%p523_p2)
}
   0x9   :  { %s527_s30 = scalar_lea.vmem %s32_s22, 768  ;;  %p532_p4 = scmp.lt.s32.totalorder %s32_s22, %s32_s22 }
   0xa   :  { %p528_p3 = scmp.ne.s32.totalorder %s32_s22, %s527_s30  ;;  %p533_p5 = scmp.lt.s32.totalorder %s527_s30, %s527_s30 }
   0xc   :  { %p534_p6 = por %p533_p5, %p532_p4 }
   0xe   :  { %p535_p7 = pnand %p534_p6, %p528_p3 }
  0x10   :  { %538 = shalt.err (!%p535_p7)
}
  0x11   :  { %s612_s7 = smov 256   ;;  %s613_s8 = smov 16  }
  0x12   :  { %37 = dma.hbm_to_vmem [thread:$0]  %s796_s1, 768, %s32_s22, [#allocation6], %s612_s7, %s612_s7, %s613_s8  }
  0x13   :  { %s614_s11 = smov [#allocation2]   ;;  %s539_s15 = scalar_lea.hbm %s795_s0, 384 }
  0x14   :  { %s19_s12 = sshll.u32 %s614_s11, 4  ;;  %p540_p8 = scmp.ne.s32.totalorder %s795_s0, %s539_s15  ;;  %s20_s12 = int_to_ptr.vmem [resolvable:$true] %s19_s12 }
  0x15   :  { %p543_p9 = scmp.lt.u32.totalorder %s539_s15, %s795_s0 }
  0x17   :  { %p545_p10 = pnand %p543_p9, %p540_p8 }
  0x19   :  { %548 = shalt.err (!%p545_p10)
}
  0x1a   :  { %s549_s20 = scalar_lea.vmem %s20_s12, 384  ;;  %p554_p12 = scmp.lt.s32.totalorder %s20_s12, %s20_s12 }
  0x1b   :  { %p550_p11 = scmp.ne.s32.totalorder %s20_s12, %s549_s20  ;;  %p555_p13 = scmp.lt.s32.totalorder %s549_s20, %s549_s20 }
  0x1d   :  { %p556_p0 = por %p555_p13, %p554_p12 }
  0x1f   :  { %p557_p1 = pnand %p556_p0, %p550_p11 }
  0x21   :  { %560 = shalt.err (!%p557_p1)
}
  0x22   :  { %s615_s1 = smov 128   ;;  %s616_s21 = smov 8  }
  0x23   :  { %25 = dma.hbm_to_vmem [thread:$0]  %s795_s0, 384, %s20_s12, [#allocation3], %s615_s1, %s615_s1, %s616_s21  }
  0x24   :  { %s617_s24 = smov [#allocation7]   ;;  %s561_s28 = scalar_lea.hbm %s800_s5, 1536 }
  0x25   :  { %s49_s25 = sshll.u32 %s617_s24, 4  ;;  %p562_p2 = scmp.ne.s32.totalorder %s800_s5, %s561_s28  ;;  %s50_s25 = int_to_ptr.vmem [resolvable:$true] %s49_s25 }
  0x26   :  { %p565_p3 = scmp.lt.u32.totalorder %s561_s28, %s800_s5 }
  0x28   :  { %p567_p4 = pnand %p565_p3, %p562_p2 }
  0x2a   :  { %570 = shalt.err (!%p567_p4)
}
  0x2b   :  { %s571_s9 = scalar_lea.vmem %s50_s25, 1536  ;;  %p576_p6 = scmp.lt.s32.totalorder %s50_s25, %s50_s25 }
  0x2c   :  { %p572_p5 = scmp.ne.s32.totalorder %s50_s25, %s571_s9  ;;  %p577_p7 = scmp.lt.s32.totalorder %s571_s9, %s571_s9 }
  0x2e   :  { %p578_p8 = por %p577_p7, %p576_p6 }
  0x30   :  { %p579_p9 = pnand %p578_p8, %p572_p5 }
  0x32   :  { %582 = shalt.err (!%p579_p9)
}
  0x33   :  { %s618_s0 = smov 512   ;;  %s619_s10 = smov 32  }
  0x34   :  { %55 = dma.hbm_to_vmem [thread:$0]  %s800_s5, 1536, %s50_s25, [#allocation6], %s618_s0, %s618_s0, %s619_s10  }
  0x35   :  { %605 = dma.done.wait [#allocation3], 384  }
  0x36   :  { %606 = vsyncadd [#allocation3], 4294966912 }
  0x37   :  { %607 = dma.done.wait [#allocation6], 2304  }
  0x38   :  { %608 = vsyncadd [#allocation6], 4294964992  ;;  %v620_v0 = vmov 0   ;;  %v501_v1 = vld [vmem:[#allocation5 + $0x4] ss:$16 sps:$4 sm:$0xff]   ;;  %vm136_vm0 = vcmask 1043456   ;;  %v79_v18 = vlaneseq }
  0x39   :  { %181 = vmatprep.mubr.bf16.mxu0 %v620_v0  ;;  %232 = vmatprep.mubr.bf16.mxu1 %v620_v0  ;;  %v503_v2 = vld [vmem:[#allocation5 + $0xc] ss:$16 sps:$4 sm:$0xff]   ;;  %v505_v3 = vld [vmem:[#allocation5] ss:$16 sps:$4 sm:$0xff]   ;;  %v506_v4 = vld [vmem:[#allocation5 + $0x8] ss:$16 sps:$4 sm:$0xff]  }
  0x3a   :  { %149 = vmatprep.subr.bf16.mxu0 %v501_v1  ;;  %v75_v5 = vld [vmem:[#allocation5 + $0x20] sm:$0xff]  ;;  %200 = vmatprep.subr.bf16.mxu1 %v503_v2  ;;  %v76_v7 = vld [vmem:[#allocation5 + $0x28] sm:$0xff]  ;;  %v67_v12 = vld [vmem:[#allocation2 + $0x8] sm:$0xff]  ;;  %vm129_vm1 = vcmask 195584   ;;  %v80_v19 = vshrl.u32 %v79_v18, 7 }
  0x3b   :  { %v481_v6 = vcombine.high %v75_v5, %v75_v5  ;;  %v480_v8 = vcombine.low %v75_v5, %v75_v5  ;;  %150 = vmatpush1.bf16.msra.mxu0 %v505_v3  ;;  %201 = vmatpush1.bf16.msra.mxu1 %v506_v4  ;;  %v483_v9 = vcombine.high %v76_v7, %v76_v7  ;;  %v66_v11 = vld [vmem:[#allocation2] sm:$0xff]  ;;  %v68_v16 = vld [vmem:[#allocation2 + $0x10] sm:$0xff] }
  0x3c   :  { %v482_v10 = vcombine.low %v76_v7, %v76_v7  ;;  %v69_v15 = vpack.c.bf16 %v67_v12, %v66_v11  ;;  %v70_v17 = vpack.c.bf16 %v68_v16, %v68_v16  ;;  %v696_v20 = vsub.s32 0, %v80_v19  ;;  %v77_v21 = vld [vmem:[%s797_s2] sm:$0xf] }
  0x3d   :  { %484 = vmatprep.subr.msk.bf16.mxu0 %vm136_vm0, %v481_v6  ;;  %v138_v13 = vsel %vm136_vm0, %v480_v8, 0  ;;  %487 = vmatprep.subr.msk.bf16.mxu1 %vm136_vm0, %v483_v9  ;;  %v701_v22 = vsub.s32 2, %v80_v19  ;;  %v703_v23 = vsub.s32 1, %v80_v19  ;;  %v708_v27 = vsub.s32 3, %v80_v19 }
  0x3e   :  { %v144_v14 = vsel %vm136_vm0, %v482_v10, 0  ;;  %v82_v24 = vrot.slane %v77_v21, %v696_v20 }
  0x3f   :  { %152 = vmatpush1.bf16.msra.mxu0 %v138_v13  ;;  %203 = vmatpush1.bf16.msra.mxu1 %v144_v14  ;;  %v90_v25 = vrot.slane %v77_v21, %v701_v22  ;;  %v86_v26 = vrot.slane %v77_v21, %v703_v23  ;;  %v94_v35 = vrot.slane %v77_v21, %v708_v27 }
  0x42   :  { %485 = vmatmul.mubr.msk.bf16.vlgmr.msra.gmra.mrb[0].mxu0 %vm129_vm1, %v69_v15  ;;  %488 = vmatmul.mubr.msk.bf16.vlgmr.msra.gmra.mrb[0].mxu1 %vm129_vm1, %v69_v15 }
  0x43   :  { %191 = vmatprep.mubr.bf16.mxu0 %v620_v0  ;;  %242 = vmatprep.mubr.bf16.mxu1 %v620_v0 }
  0x4a   :  { %486 = vmatmul.mubr.msk.bf16.gmra.mrb[4].mxu0 %vm129_vm1, %v70_v17  ;;  %489 = vmatmul.mubr.msk.bf16.gmra.mrb[4].mxu1 %vm129_vm1, %v70_v17 }
 0x115   :  { %v183_v28 = vpop.f32.mrb[0].mxu0  ;;  %v234_v29 = vpop.f32.mrb[0].mxu1 }
 0x116   :  { %v184_v30 = vadd.f32 %v183_v28, %v82_v24  ;;  %v185_v31 = vpop.f32.mrb[1].mxu0  ;;  %v236_v32 = vpop.f32.mrb[1].mxu1  ;;  %v235_v33 = vadd.f32 %v234_v29, %v90_v25 }
 0x117   :  { %v186_v34 = vadd.f32 %v185_v31, %v86_v26  ;;  %v187_v36 = vpop.f32.mrb[2].mxu0  ;;  %v238_v37 = vpop.f32.mrb[2].mxu1  ;;  %v237_v43 = vadd.f32 %v236_v32, %v94_v35 }
 0x118   :  { %v188_v38 = vadd.f32 %v187_v36, %v82_v24  ;;  %v189_v39 = vpop.f32.mrb[3].mxu0  ;;  %v240_v40 = vpop.f32.mrb[3].mxu1  ;;  %v239_v44 = vadd.f32 %v238_v37, %v90_v25 }
 0x119   :  { %v253_v41 = vadd.f32 %v186_v34, %v184_v30  ;;  %v190_v42 = vadd.f32 %v189_v39, %v86_v26  ;;  %v241_v54 = vadd.f32 %v240_v40, %v94_v35 }
 0x11b   :  { %v258_v45 = vadd.f32 %v190_v42, %v188_v38  ;;  %v254_v46 = vadd.f32 %v253_v41, %v235_v33 }
 0x11d   :  { %v193_v47 = vpop.f32.mrb[4].mxu0  ;;  %v244_v48 = vpop.f32.mrb[4].mxu1  ;;  %v255_v49 = vadd.f32 %v254_v46, %v237_v43  ;;  %v259_v50 = vadd.f32 %v258_v45, %v239_v44 }
 0x11e   :  { %v194_v51 = vadd.f32 %v193_v47, %v82_v24  ;;  %v195_v52 = vpop.f32.mrb[5].mxu0  ;;  %v246_v53 = vpop.f32.mrb[5].mxu1  ;;  %v245_v55 = vadd.f32 %v244_v48, %v90_v25 }
 0x11f   :  { %v196_v56 = vadd.f32 %v195_v52, %v86_v26  ;;  %v197_v57 = vpop.f32.mrb[6].mxu0  ;;  %v248_v58 = vpop.f32.mrb[6].mxu1  ;;  %256 = vadd.xlane.f32.xlu0 %v255_v49  ;;  %v260_v62 = vadd.f32 %v259_v50, %v241_v54  ;;  %v247_v63 = vadd.f32 %v246_v53, %v94_v35  ;;  %v251_v53 = vld [vmem:[%s798_s3] sm:$0xf]  ;;  %s621_s3 = smov [#allocation8]  }
 0x120   :  { %v198_v59 = vpop.f32.mrb[7].mxu0  ;;  %v249_v60 = vpop.f32.mrb[7].mxu1  ;;  %v344_v57 = vrot.slane %v251_v53, %v701_v22  ;;  %v340_v58 = vrot.slane %v251_v53, %v703_v23 }
 0x121   :  { %v263_v61 = vadd.f32 %v196_v56, %v194_v51  ;;  %v348_v59 = vrot.slane %v251_v53, %v708_v27 }
 0x123   :  { %261 = vadd.xlane.f32.xlu0 %v260_v62  ;;  %v264_v0 = vadd.f32 %v263_v61, %v245_v55 }
 0x125   :  { %v265_v1 = vadd.f32 %v264_v0, %v247_v63 }
 0x127   :  { %266 = vadd.xlane.f32.xlu1 %v265_v1 }
 0x1ac   :  { %v257_v2 = vpop.xlane.xlu0 %256 }
 0x1ad   :  { %v269_v3 = vmul.f32 0.001953125, %v257_v2 }
 0x1af   :  { %v711_v4 = vsub.f32 %v184_v30, %v269_v3  ;;  %v713_v5 = vsub.f32 %v186_v34, %v269_v3  ;;  %v715_v6 = vsub.f32 %v235_v33, %v269_v3  ;;  %v275_v8 = vsub.f32 %v237_v43, %v269_v3 }
 0x1b0   :  { %v262_v7 = vpop.xlane.xlu0 %261 }
 0x1b1   :  { %v270_v9 = vmul.f32 0.001953125, %v262_v7  ;;  %v284_v10 = vmul.f32 %v711_v4, %v711_v4  ;;  %v285_v11 = vmul.f32 %v713_v5, %v713_v5  ;;  %v286_v12 = vmul.f32 %v715_v6, %v715_v6 }
 0x1b2   :  { %v287_v18 = vmul.f32 %v275_v8, %v275_v8 }
 0x1b3   :  { %v723_v13 = vsub.f32 %v188_v38, %v270_v9  ;;  %v725_v14 = vsub.f32 %v190_v42, %v270_v9  ;;  %v296_v15 = vadd.f32 %v285_v11, %v284_v10  ;;  %v727_v16 = vsub.f32 %v239_v44, %v270_v9 }
 0x1b4   :  { %v267_v17 = vpop.xlane.xlu1 %266  ;;  %v729_v19 = vsub.f32 %v241_v54, %v270_v9 }
 0x1b5   :  { %v271_v21 = vmul.f32 0.001953125, %v267_v17  ;;  %v297_v24 = vadd.f32 %v296_v15, %v286_v12  ;;  %v288_v25 = vmul.f32 %v723_v13, %v723_v13  ;;  %v289_v26 = vmul.f32 %v725_v14, %v725_v14 }
 0x1b6   :  { %v290_v28 = vmul.f32 %v727_v16, %v727_v16  ;;  %v291_v33 = vmul.f32 %v729_v19, %v729_v19 }
 0x1b7   :  { %v737_v29 = vsub.f32 %v194_v51, %v271_v21  ;;  %v739_v30 = vsub.f32 %v196_v56, %v271_v21  ;;  %v298_v31 = vadd.f32 %v297_v24, %v287_v18  ;;  %v301_v32 = vadd.f32 %v289_v26, %v288_v25 }
 0x1b8   :  { %v743_v34 = vsub.f32 %v245_v55, %v271_v21  ;;  %v745_v36 = vsub.f32 %v247_v63, %v271_v21  ;;  %v252_v55 = vld [vmem:[%s799_s4] sm:$0xf]  ;;  %v336_v56 = vrot.slane %v251_v53, %v696_v20  ;;  %s463_s4 = sshll.u32 %s621_s3, 4  ;;  %s464_s4 = int_to_ptr.vmem [resolvable:$true] %s463_s4 }
 0x1b9   :  { %299 = vadd.xlane.f32.xlu1 %v298_v31  ;;  %v302_v35 = vadd.f32 %v301_v32, %v290_v28  ;;  %v292_v37 = vmul.f32 %v737_v29, %v737_v29  ;;  %v293_v38 = vmul.f32 %v739_v30, %v739_v30  ;;  %v369_v61 = vrot.slane %v252_v55, %v696_v20  ;;  %v425_v53 = vld [vmem:[#allocation7 + $0x18] sm:$0xff]  ;;  %s583_s17 = scalar_lea.vmem %s464_s4, 1536  ;;  %p588_p11 = scmp.lt.s32.totalorder %s464_s4, %s464_s4 }
 0x1ba   :  { %v294_v40 = vmul.f32 %v743_v34, %v743_v34  ;;  %v295_v42 = vmul.f32 %v745_v36, %v745_v36  ;;  %v377_v62 = vrot.slane %v252_v55, %v701_v22  ;;  %v373_v63 = vrot.slane %v252_v55, %v703_v23  ;;  %p584_p10 = scmp.ne.s32.totalorder %s464_s4, %s583_s17  ;;  %p589_p12 = scmp.lt.s32.totalorder %s583_s17, %s583_s17 }
 0x1bb   :  { %v303_v39 = vadd.f32 %v302_v35, %v291_v33  ;;  %v306_v41 = vadd.f32 %v293_v38, %v292_v37  ;;  %v381_v0 = vrot.slane %v252_v55, %v708_v27 }
 0x1bc   :  { %p590_p13 = por %p589_p12, %p588_p11 }
 0x1bd   :  { %304 = vadd.xlane.f32.xlu0 %v303_v39  ;;  %v307_v43 = vadd.f32 %v306_v41, %v294_v40 }
 0x1be   :  { %p591_p0 = pnand %p590_p13, %p584_p10 }
 0x1bf   :  { %v308_v44 = vadd.f32 %v307_v43, %v295_v42 }
 0x1c1   :  { %309 = vadd.xlane.f32.xlu1 %v308_v44 }
 0x246   :  { %v300_v45 = vpop.xlane.xlu1 %299 }
 0x247   :  { %v311_v46 = vmul.f32 0.001953125, %v300_v45 }
 0x249   :  { %v314_v47 = vadd.f32 1e-05, %v311_v46 }
 0x24a   :  { %v305_v48 = vpop.xlane.xlu0 %304 }
 0x24b   :  { %511 = vrsqrt.f32 %v314_v47  ;;  %v312_v49 = vmul.f32 0.001953125, %v305_v48  ;;  %v422_v47 = vld [vmem:[#allocation7] sm:$0xff] }
 0x24d   :  { %v315_v50 = vadd.f32 1e-05, %v312_v49 }
 0x24e   :  { %v310_v51 = vpop.xlane.xlu1 %309 }
 0x24f   :  { %513 = vrsqrt.f32 %v315_v50  ;;  %v313_v52 = vmul.f32 0.001953125, %v310_v51  ;;  %v423_v51 = vld [vmem:[#allocation7 + $0x8] sm:$0xff] }
 0x251   :  { %v316_v54 = vadd.f32 1e-05, %v313_v52  ;;  %v424_v52 = vld [vmem:[#allocation7 + $0x10] sm:$0xff] }
 0x253   :  { %515 = vrsqrt.f32 %v316_v54 }
 0x255   :  { %v512_v60 = vpop.eup %511 }
 0x256   :  { %v320_v1 = vmul.f32 %v512_v60, %v711_v4  ;;  %v321_v2 = vmul.f32 %v512_v60, %v713_v5  ;;  %v322_v3 = vmul.f32 %v512_v60, %v715_v6  ;;  %v323_v7 = vmul.f32 %v512_v60, %v275_v8 }
 0x258   :  { %v353_v9 = vmul.f32 %v336_v56, %v320_v1  ;;  %v354_v10 = vmul.f32 %v340_v58, %v321_v2  ;;  %v355_v11 = vmul.f32 %v344_v57, %v322_v3  ;;  %v356_v12 = vmul.f32 %v348_v59, %v323_v7  ;;  %v426_v3 = vld [vmem:[#allocation7 + $0x20] sm:$0xff]  ;;  %v427_v7 = vld [vmem:[#allocation7 + $0x28] sm:$0xff] }
 0x259   :  { %v514_v15 = vpop.eup %513 }
 0x25a   :  { %v386_v17 = vadd.f32 %v369_v61, %v353_v9  ;;  %v387_v20 = vadd.f32 %v373_v63, %v354_v10  ;;  %v388_v18 = vadd.f32 %v377_v62, %v355_v11  ;;  %v389_v22 = vadd.f32 %v381_v0, %v356_v12  ;;  %v428_v9 = vld [vmem:[#allocation7 + $0x30] sm:$0xff]  ;;  %v429_v10 = vld [vmem:[#allocation7 + $0x38] sm:$0xff] }
 0x25b   :  { %v324_v23 = vmul.f32 %v514_v15, %v723_v13  ;;  %v325_v27 = vmul.f32 %v514_v15, %v725_v14  ;;  %v326_v4 = vmul.f32 %v514_v15, %v727_v16  ;;  %v327_v5 = vmul.f32 %v514_v15, %v729_v19 }
 0x25c   :  { %v398_v21 = vmax.f32 %v386_v17, 0.0  ;;  %v399_v6 = vmax.f32 %v387_v20, 0.0  ;;  %v400_v8 = vmax.f32 %v388_v18, 0.0  ;;  %v401_v24 = vmax.f32 %v389_v22, 0.0  ;;  %v430_v17 = vld [vmem:[#allocation7 + $0x40] sm:$0xff]  ;;  %v431_v22 = vld [vmem:[#allocation7 + $0x48] sm:$0xff] }
 0x25d   :  { %v516_v25 = vpop.eup %515  ;;  %v357_v26 = vmul.f32 %v336_v56, %v324_v23  ;;  %v358_v28 = vmul.f32 %v340_v58, %v325_v27  ;;  %v359_v31 = vmul.f32 %v344_v57, %v326_v4  ;;  %v360_v32 = vmul.f32 %v348_v59, %v327_v5  ;;  %v433_v23 = vld [vmem:[#allocation7 + $0x58] sm:$0xff] }
 0x25e   :  { %v410_v33 = vmul.f32 22.627417, %v398_v21  ;;  %v411_v35 = vmul.f32 22.627417, %v399_v6  ;;  %v412_v37 = vmul.f32 22.627417, %v400_v8  ;;  %v328_v13 = vmul.f32 %v516_v25, %v737_v29 }
 0x25f   :  { %v413_v38 = vmul.f32 22.627417, %v401_v24  ;;  %v390_v14 = vadd.f32 %v369_v61, %v357_v26  ;;  %v391_v39 = vadd.f32 %v373_v63, %v358_v28  ;;  %v392_v16 = vadd.f32 %v377_v62, %v359_v31 }
 0x260   :  { %v393_v40 = vadd.f32 %v381_v0, %v360_v32  ;;  %v329_v19 = vmul.f32 %v516_v25, %v739_v30  ;;  %v330_v41 = vmul.f32 %v516_v25, %v743_v34  ;;  %v331_v42 = vmul.f32 %v516_v25, %v745_v36 }
 0x261   :  { %v402_v43 = vmax.f32 %v390_v14, 0.0  ;;  %v403_v44 = vmax.f32 %v391_v39, 0.0  ;;  %v404_v45 = vmax.f32 %v392_v16, 0.0  ;;  %v361_v46 = vmul.f32 %v336_v56, %v328_v13 }
 0x262   :  { %v405_v48 = vmax.f32 %v393_v40, 0.0  ;;  %v362_v49 = vmul.f32 %v340_v58, %v329_v19  ;;  %v363_v50 = vmul.f32 %v344_v57, %v330_v41  ;;  %v364_v29 = vmul.f32 %v348_v59, %v331_v42 }
 0x263   :  { %v414_v54 = vmul.f32 22.627417, %v402_v43  ;;  %v415_v55 = vmul.f32 22.627417, %v403_v44  ;;  %v416_v60 = vmul.f32 22.627417, %v404_v45  ;;  %v394_v30 = vadd.f32 %v369_v61, %v361_v46 }
 0x264   :  { %v417_v1 = vmul.f32 22.627417, %v405_v48  ;;  %v395_v34 = vadd.f32 %v373_v63, %v362_v49  ;;  %v396_v2 = vadd.f32 %v377_v62, %v363_v50  ;;  %v397_v36 = vadd.f32 %v381_v0, %v364_v29  ;;  %v432_v61 = vld [vmem:[#allocation7 + $0x50] sm:$0xff] }
 0x265   :  { %v406_v56 = vmax.f32 %v394_v30, 0.0  ;;  %v434_v11 = vadd.f32 %v422_v47, %v410_v33  ;;  %v435_v58 = vadd.f32 %v423_v51, %v411_v35  ;;  %v436_v57 = vadd.f32 %v424_v52, %v412_v37 }
 0x266   :  { %v407_v59 = vmax.f32 %v395_v34, 0.0  ;;  %v408_v12 = vmax.f32 %v396_v2, 0.0  ;;  %v409_v15 = vmax.f32 %v397_v36, 0.0  ;;  %v437_v20 = vadd.f32 %v425_v53, %v413_v38 }
 0x267   :  { %v418_v18 = vmul.f32 22.627417, %v406_v56  ;;  %v438_v63 = vadd.f32 %v426_v3, %v414_v54  ;;  %v439_v62 = vadd.f32 %v427_v7, %v415_v55  ;;  %v440_v0 = vadd.f32 %v428_v9, %v416_v60  ;;  %446 = vst [vmem:[#allocation8] sm:$0xff] %v434_v11  ;;  %447 = vst [vmem:[#allocation8 + $0x8] sm:$0xff] %v435_v58 }
 0x268   :  { %448 = vst [vmem:[#allocation8 + $0x10] sm:$0xff] %v436_v57  ;;  %v419_v27 = vmul.f32 22.627417, %v407_v59  ;;  %v420_v4 = vmul.f32 22.627417, %v408_v12  ;;  %v441_v21 = vadd.f32 %v429_v10, %v417_v1  ;;  %449 = vst [vmem:[#allocation8 + $0x18] sm:$0xff] %v437_v20 }
 0x269   :  { %v421_v5 = vmul.f32 22.627417, %v409_v15  ;;  %v442_v6 = vadd.f32 %v430_v17, %v418_v18  ;;  %450 = vst [vmem:[#allocation8 + $0x20] sm:$0xff] %v438_v63  ;;  %451 = vst [vmem:[#allocation8 + $0x28] sm:$0xff] %v439_v62 }
 0x26a   :  { %452 = vst [vmem:[#allocation8 + $0x30] sm:$0xff] %v440_v0  ;;  %v443_v8 = vadd.f32 %v431_v22, %v419_v27  ;;  %v444_v24 = vadd.f32 %v432_v61, %v420_v4  ;;  %453 = vst [vmem:[#allocation8 + $0x38] sm:$0xff] %v441_v21 }
 0x26b   :  { %v445_v25 = vadd.f32 %v433_v23, %v421_v5  ;;  %454 = vst [vmem:[#allocation8 + $0x40] sm:$0xff] %v442_v6 }
 0x26c   :  { %455 = vst [vmem:[#allocation8 + $0x48] sm:$0xff] %v443_v8  ;;  %456 = vst [vmem:[#allocation8 + $0x50] sm:$0xff] %v444_v24 }
 0x26d   :  { %457 = vst [vmem:[#allocation8 + $0x58] sm:$0xff] %v445_v25 }
 0x26e   :  { %594 = shalt.err (!%p591_p0)
}
 0x26f   :  { %s595_s20 = scalar_lea.hbm %s801_s6, 1536 }
 0x270   :  { %p596_p1 = scmp.ne.s32.totalorder %s801_s6, %s595_s20  ;;  %p599_p2 = scmp.lt.u32.totalorder %s595_s20, %s801_s6 }
 0x272   :  { %p601_p3 = pnand %p599_p2, %p596_p1 }
 0x274   :  { %604 = shalt.err (!%p601_p3)
}
 0x275   :  { %469 = dma.vmem_to_hbm [thread:$0]  %s464_s4, 1536, %s801_s6, [#allocation4], %s618_s0, %s618_s0, %s619_s10  }
 0x276   :  { %609 = dma.done.wait [#allocation4], 1536  }
 0x277   :  { %610 = vsyncadd [#allocation4], 4294965760 }
 0x278   :  { %473 = vsyncpa [#allocation3], 1 }
 0x279   :  { %474 = vsyncpa [#allocation6], 1 }
 0x27a   :  { %475 = vsyncpa [#allocation4], 1 }

</bundles_post_ra>
